<compile_context>
chip_gen: v6e
topology: v6e:2x2x1
jax: 0.10.0
libtpu: 0.0.40
codegen_flags: <defaults>
</compile_context>

<pallas_src>
import functools
from typing import Optional

import jax
import jax.numpy as jnp
from jax.experimental import pallas as pl
from jax.experimental.pallas import tpu as pltpu


def _round_up(x: int, m: int) -> int:
    return ((x + m - 1) // m) * m


# D up to this size stays a single full-extent K block (no D padding needed).
_SINGLE_K_MAX = 2048


def _num_tensorcores() -> int:
    """Best-effort TensorCore count for batch-axis splitting (v7x has 2)."""
    try:
        d = jax.devices()[0]
        for attr in ("num_cores", "core_count"):
            v = getattr(d, attr, None)
            if isinstance(v, int) and v > 0:
                return int(v)
    except Exception:
        pass
    return 1


def _vmem_budget() -> int:
    """~75% of physical VMEM (48 MiB on v7x, 96 MiB on v5e/v6e)."""
    try:
        cap = int(pltpu.get_tpu_info().vmem_capacity_bytes)
    except Exception:
        cap = 64 << 20  # conservative (v7x-sized) fallback
    return (cap * 3) // 4


# ----------------------------------------------------------------------------
# Fused Pallas kernel: acc += x_tile @ W_tile ; epilogue = bias + activations
# ----------------------------------------------------------------------------
def _glm_fused_kernel(x_ref, w_ref, b_ref, o_ref, acc_ref, *, heads):
    """x_ref: (tb, tk)  w_ref: (tk, Op)  b_ref: (1, Op)  o_ref: (tb, Op).

    heads: static tuple of (start, out_dim, activation); heads are packed
    contiguously (compact), only the total Op is a multiple of 128 lanes.
    """
    k = pl.program_id(1)

    @pl.when(k == 0)
    def _init():
        acc_ref[...] = jnp.zeros_like(acc_ref)

    acc_ref[...] += jnp.dot(x_ref[...], w_ref[...],
                            preferred_element_type=jnp.float32)

    @pl.when(k == pl.num_programs(1) - 1)
    def _finalize():
        # O_pad is compact (sum of real head widths rounded to 128), so the
        # whole (tb, O_pad) f32 tile stays small.  Per-head work uses iota
        # masks; the final store is one unmasked, full-lane vst.
        y = acc_ref[...] + b_ref[...].astype(jnp.float32)
        col = jax.lax.broadcasted_iota(jnp.int32, y.shape, 1)
        out = y                      # identity heads (and pad cols) pass through
        sig = None
        for (start, out_dim, activation) in heads:
            if activation == "identity":
                continue
            in_head = (col >= start) & (col < start + out_dim)
            if activation == "sigmoid":
                if sig is None:
                    sig = jax.nn.sigmoid(y)
                out = jnp.where(in_head, sig, out)
            elif activation == "softmax":
                logits = jnp.where(in_head, y, jnp.float32(-1e30))
                m = jnp.max(logits, axis=-1, keepdims=True)
                e = jnp.where(in_head, jnp.exp(logits - m), jnp.float32(0.0))
                s = jnp.sum(e, axis=-1, keepdims=True)
                out = jnp.where(in_head, e * pl.reciprocal(s, approx=True), out)
            else:
                raise ValueError(f"unknown activation: {activation}")
        o_ref[...] = out.astype(o_ref.dtype)


def glm_fused_forward(x: jax.Array, w_t: jax.Array, bias2d: jax.Array,
                      heads, *, tile_b: int = 256, tile_k: int = 1024,
                      out_dtype=jnp.float32) -> jax.Array:
    """Fused multi-head GLM forward.

    x:      [B, Dx]  (Dx <= D; any D padding of W was done at construction)
    w_t:    [D, O_pad]  pre-transposed, compactly packed heads, lane-padded
    bias2d: [1, O_pad]  f32
    heads:  tuple of (start, out_dim, activation)

    Returns [B, O_pad] (callers slice out each head's real columns).
    """
    B, Dx = x.shape
    D, O_pad = w_t.shape
    assert O_pad % 128 == 0 and Dx <= D

    isx = jnp.dtype(x.dtype).itemsize
    isw = jnp.dtype(w_t.dtype).itemsize
    iso = jnp.dtype(out_dtype).itemsize

    # --- K (reduction) tiling: W was padded along D once at construction ----
    if D % 128 != 0 or D <= tile_k:
        tk = D                                  # full-extent block, always legal
    else:
        tk = min(_round_up(tile_k, 128), D)
        while D % tk:                           # largest 128-multiple dividing D
            tk -= 128
    num_k = D // tk

    # --- batch tile ----------------------------------------------------------
    tb = min(_round_up(tile_b, 8), _round_up(B, 8))
    cores = _num_tensorcores()
    if cores >= 2 and _round_up(B, 8) <= tb and B >= cores * 128:
        # Split the "parallel" batch axis so it can shard across TensorCores.
        tb = _round_up(-(-B // cores), 8)

    budget = _vmem_budget()

    def _needed(tb_):
        # double-buffered x & W tiles, double-buffered out tile, acc, bias
        return int(2 * (tb_ * tk * isx + tk * O_pad * isw)
                   + 2 * tb_ * O_pad * iso + tb_ * O_pad * 4 + 2 * O_pad * 4)

    while _needed(tb) > budget and tb > 8:
        tb = max(8, _round_up(tb // 2, 8))

    Bp = _round_up(B, tb)
    num_b = Bp // tb

    pad_b, pad_d = Bp - B, D - Dx
    if pad_b or pad_d:
        # Padded W rows are zero, so D-pad values are irrelevant; B-pad rows
        # are sliced off at the end.
        # TODO(synk): for hot production batch sizes pick tb | B to skip this copy.
        x = jnp.pad(x, ((0, pad_b), (0, pad_d)))

    vmem_limit = int(min(max(2 * _needed(tb), 32 << 20), budget))

    n_act_cols = sum(o for (_, o, a) in heads if a != "identity")
    cost = pl.CostEstimate(
        flops=2 * Bp * D * O_pad,
        transcendentals=int(Bp * n_act_cols),
        bytes_accessed=int(Bp * D * isx + num_b * D * O_pad * isw
                           + O_pad * 4 + Bp * O_pad * iso),
    )

    kernel = functools.partial(_glm_fused_kernel, heads=tuple(heads))

    out = pl.pallas_call(
        kernel,
        out_shape=jax.ShapeDtypeStruct((Bp, O_pad), out_dtype),
        grid_spec=pltpu.PrefetchScalarGridSpec(
            num_scalar_prefetch=0,
            grid=(num_b, num_k),
            in_specs=[
                pl.BlockSpec((tb, tk), lambda i, k: (i, k)),     # x tile
                pl.BlockSpec((tk, O_pad), lambda i, k: (k, 0)),  # W tile
                pl.BlockSpec((1, O_pad), lambda i, k: (0, 0)),   # bias
            ],
            out_specs=pl.BlockSpec((tb, O_pad), lambda i, k: (i, 0)),
            scratch_shapes=[pltpu.VMEM((tb, O_pad), jnp.float32)],
        ),
        compiler_params=pltpu.CompilerParams(
            dimension_semantics=("parallel", "arbitrary"),
            vmem_limit_bytes=vmem_limit,
        ),
        cost_estimate=cost,
    )(x, w_t, bias2d)

    return out[:B] if Bp != B else out


# ----------------------------------------------------------------------------
# GLMStructured: dict of heads compactly packed into one lane-dense matrix
# ----------------------------------------------------------------------------
_TASK_ACTIVATION = {
    "regression": "identity",
    "binary": "sigmoid",
    "multiclass": "softmax",
}


class GLMStructured:
    """JAX/Pallas port of the PyTorch GLMStructured module."""

    def __init__(self, input_dim: int, tasks: dict, key: jax.Array,
                 param_dtype=jnp.bfloat16):
        # tasks: name -> (output_dim, tasktype)
        self.input_dim = input_dim
        self.param_dtype = param_dtype
        self.params = {}                 # torch-layout (W[O,D] f32, b[O] f32)
        self.activations = {}
        self.heads = {}                  # name -> (start, out_dim, activation)
        self._per_head = {}

        names = sorted(tasks)
        keys = jax.random.split(key, len(names))

        start = 0
        raw = {}
        for name, k in zip(names, keys):
            out_dim, tasktype = tasks[name]
            activation = _TASK_ACTIVATION[tasktype]
            kw, kb = jax.random.split(k)
            bound = 1.0 / (float(input_dim) ** 0.5)   # mimic nn.Linear init
            w = jax.random.uniform(kw, (out_dim, input_dim), jnp.float32,
                                   -bound, bound)
            b = jax.random.uniform(kb, (out_dim,), jnp.float32, -bound, bound)
            self.params[name] = (w, b)
            self.activations[name] = activation
            self.heads[name] = (start, out_dim, activation)   # compact packing
            raw[name] = (w, b)
            start += out_dim

        o_real = start
        o_pad = _round_up(max(o_real, 1), 128)
        # Pad D once at construction (never per call), only when it is both
        # large and lane-misaligned.
        if input_dim % 128 == 0 or input_dim <= _SINGLE_K_MAX:
            d_pad = input_dim
        else:
            d_pad = _round_up(input_dim, 128)
        self.d_pad = d_pad

        fused_w = jnp.zeros((d_pad, o_pad), param_dtype)
        fused_b = jnp.zeros((1, o_pad), jnp.float32)
        for name in names:
            s, o, _ = self.heads[name]
            w, b = raw[name]
            fused_w = fused_w.at[:input_dim, s:s + o].set(w.T.astype(param_dtype))
            fused_b = fused_b.at[:, s:s + o].set(b[None, :])
        self.fused_w = fused_w            # [D_pad, O_total_pad]
        self.fused_b = fused_b            # [1, O_total_pad]
        self.fused_heads = tuple(self.heads[n] for n in names)

        # Per-head slabs for single-head (dataset_name=...) calls.
        for name in names:
            _, o, act = self.heads[name]
            w, b = raw[name]
            p = _round_up(o, 128)
            w_t = jnp.zeros((d_pad, p), param_dtype)
            w_t = w_t.at[:input_dim, :o].set(w.T.astype(param_dtype))
            b_p = jnp.zeros((1, p), jnp.float32).at[:, :o].set(b[None, :])
            self._per_head[name] = (w_t, b_p, (0, o, act))

    def _prep_x(self, x):
        return x.astype(self.param_dtype) if x.dtype != self.param_dtype else x

    def __call__(self, x: jax.Array, dataset_name: Optional[str] = None):
        xin = self._prep_x(x)
        if dataset_name is None:
            y = glm_fused_forward(xin, self.fused_w, self.fused_b,
                                  self.fused_heads, out_dtype=jnp.float32)
            return {name: y[:, s:s + o]
                    for name, (s, o, _) in self.heads.items()}
        w_t, b_p, head = self._per_head[dataset_name]
        y = glm_fused_forward(xin, w_t, b_p, (head,), out_dtype=jnp.float32)
        return y[:, :head[1]]


# ----------------------------------------------------------------------------
# Reference (plain JAX, bf16-quantized weights/inputs) for a correctness check
# ----------------------------------------------------------------------------
def _ref_head(x, w, b, activation, param_dtype):
    xq = x.astype(param_dtype).astype(jnp.float32)
    wq = w.astype(param_dtype).astype(jnp.float32)
    y = xq @ wq.T + b
    if activation == "sigmoid":
        return jax.nn.sigmoid(y)
    if activation == "softmax":
        return jax.nn.softmax(y, axis=-1)
    return y


if __name__ == "__main__":
    key = jax.random.PRNGKey(0)
    k_x, k_params = jax.random.split(key)

    batch, input_dim = 16, 32
    tasks = {
        "reg_head": (8, "regression"),     # identity activation
        "bin_head": (4, "binary"),         # sigmoid
        "cls_head": (16, "multiclass"),    # softmax over classes
    }

    x = jax.random.normal(k_x, (batch, input_dim), jnp.float32)
    model = GLMStructured(input_dim, tasks, k_params)

    # Forward over all heads (dataset_name=None) — single fused kernel call.
    outs = model(x)
    outs = jax.tree_util.tree_map(jax.block_until_ready, outs)

    # Forward for a single named head.
    single = jax.block_until_ready(model(x, dataset_name="cls_head"))

    # Correctness vs. plain-JAX reference (bf16 params -> loosened tolerance).
    ok = True
    for name, (w, b) in model.params.items():
        ref = _ref_head(x, w, b, model.activations[name], model.param_dtype)
        ok &= outs[name].shape == ref.shape
        ok &= bool(jnp.allclose(outs[name], ref, atol=1e-2, rtol=1e-2))
    ref_single = _ref_head(x, *model.params["cls_head"],
                           model.activations["cls_head"], model.param_dtype)
    ok &= single.shape == ref_single.shape
    ok &= bool(jnp.allclose(single, ref_single, atol=1e-2, rtol=1e-2))

    if ok:
        print("KERNEL_OK")
    else:
        raise SystemExit("mismatch vs reference")
</pallas_src>

<mosaic_0001>
module attributes {stable_mosaic.version = 11 : i64} {
  func.func @_glm_fused_kernel(%arg0: i32, %arg1: i32, %arg2: memref<16x32xbf16, #tpu.memory_space<vmem>>, %arg3: memref<32x128xbf16, #tpu.memory_space<vmem>>, %arg4: memref<1x128xf32, #tpu.memory_space<vmem>>, %arg5: memref<16x128xf32, #tpu.memory_space<vmem>>, %arg6: memref<16x128xf32, #tpu.memory_space<vmem>>) attributes {dimension_semantics = [#tpu.dimension_semantics<parallel>, #tpu.dimension_semantics<arbitrary>], iteration_bounds = array<i64: 1, 1>, scalar_prefetch = 0 : i64, scratch_operands = 1 : i64, tpu.core_type = #tpu.core_type<tc>, window_params = [{transform_indices = @transform_0, window_bounds = array<i64: 16, 32>}, {transform_indices = @transform_1, window_bounds = array<i64: 32, 128>}, {pipeline_mode = #tpu.pipeline_mode<synchronous>, transform_indices = @transform_2, window_bounds = array<i64: 1, 128>}, {transform_indices = @transform_3, window_bounds = array<i64: 16, 128>}]} {
    %c0_i32 = arith.constant 0 : i32
    %0 = arith.cmpi eq, %arg1, %c0_i32 : i32
    %1 = arith.extui %0 : i1 to i32
    %c0_i32_0 = arith.constant 0 : i32
    %2 = arith.cmpi ne, %1, %c0_i32_0 : i32
    scf.if %2 {
      %cst_10 = arith.constant 0.000000e+00 : f32
      %12 = vector.broadcast %cst_10 : f32 to vector<16x128xf32>
      %c0_11 = arith.constant 0 : index
      %c0_12 = arith.constant 0 : index
      %13 = vector.load %arg6[%c0_11, %c0_12] : memref<16x128xf32, #tpu.memory_space<vmem>>, vector<16x128xf32>
      tpu.vector_store %arg6[%c0_11, %c0_12], %12 {strides = array<i32>} : memref<16x128xf32, #tpu.memory_space<vmem>>, vector<16x128xf32>,
    } else {
    }
    %c0 = arith.constant 0 : index
    %c0_1 = arith.constant 0 : index
    %3 = vector.load %arg6[%c0, %c0_1] : memref<16x128xf32, #tpu.memory_space<vmem>>, vector<16x128xf32>
    %c0_2 = arith.constant 0 : index
    %c0_3 = arith.constant 0 : index
    %4 = vector.load %arg2[%c0_2, %c0_3] : memref<16x32xbf16, #tpu.memory_space<vmem>>, vector<16x32xbf16>
    %c0_4 = arith.constant 0 : index
    %c0_5 = arith.constant 0 : index
    %5 = vector.load %arg3[%c0_4, %c0_5] : memref<32x128xbf16, #tpu.memory_space<vmem>>, vector<32x128xbf16>
    %cst = arith.constant dense<0.000000e+00> : vector<16x128xf32>
    %6 = tpu.matmul %4, %5, %cst {dimension_numbers = #tpu.dot_dimension_numbers<[1], [0], [0], [1], [0, 0, 1, 1], [], []>} : vector<16x32xbf16>, vector<32x128xbf16>, vector<16x128xf32> -> vector<16x128xf32>
    %7 = arith.addf %3, %6 : vector<16x128xf32>
    %c0_6 = arith.constant 0 : index
    %c0_7 = arith.constant 0 : index
    %8 = vector.load %arg6[%c0_6, %c0_7] : memref<16x128xf32, #tpu.memory_space<vmem>>, vector<16x128xf32>
    tpu.vector_store %arg6[%c0_6, %c0_7], %7 {strides = array<i32>} : memref<16x128xf32, #tpu.memory_space<vmem>>, vector<16x128xf32>,
    %c0_i32_8 = arith.constant 0 : i32
    %9 = arith.cmpi eq, %arg1, %c0_i32_8 : i32
    %10 = arith.extui %9 : i1 to i32
    %c0_i32_9 = arith.constant 0 : i32
    %11 = arith.cmpi ne, %10, %c0_i32_9 : i32
    scf.if %11 {
      %c0_10 = arith.constant 0 : index
      %c0_11 = arith.constant 0 : index
      %12 = vector.load %arg6[%c0_10, %c0_11] : memref<16x128xf32, #tpu.memory_space<vmem>>, vector<16x128xf32>
      %c0_12 = arith.constant 0 : index
      %c0_13 = arith.constant 0 : index
      %13 = vector.load %arg4[%c0_12, %c0_13] : memref<1x128xf32, #tpu.memory_space<vmem>>, vector<1x128xf32>
      %14 = vector.broadcast %13 : vector<1x128xf32> to vector<16x128xf32>
      %15 = arith.addf %12, %14 : vector<16x128xf32>
      %16 = tpu.iota {dimensions = array<i32: 1>} : vector<16x128xi32>
      %c0_i32_14 = arith.constant 0 : i32
      %17 = vector.broadcast %c0_i32_14 : i32 to vector<16x128xi32>
      %18 = arith.cmpi sge, %16, %17 : vector<16x128xi32>
      %c4_i32 = arith.constant 4 : i32
      %19 = vector.broadcast %c4_i32 : i32 to vector<16x128xi32>
      %20 = arith.cmpi slt, %16, %19 : vector<16x128xi32>
      %21 = arith.andi %18, %20 : vector<16x128xi1>
      %22 = arith.negf %15 : vector<16x128xf32>
      %23 = math.exp %22 : vector<16x128xf32>
      %cst_15 = arith.constant 1.000000e+00 : f32
      %24 = vector.broadcast %cst_15 : f32 to vector<16x128xf32>
      %25 = arith.addf %24, %23 : vector<16x128xf32>
      %26 = arith.divf %24, %25 : vector<16x128xf32>
      %27 = arith.select %21, %26, %15 : vector<16x128xi1>, vector<16x128xf32>
      %c4_i32_16 = arith.constant 4 : i32
      %28 = vector.broadcast %c4_i32_16 : i32 to vector<16x128xi32>
      %29 = arith.cmpi sge, %16, %28 : vector<16x128xi32>
      %c20_i32 = arith.constant 20 : i32
      %30 = vector.broadcast %c20_i32 : i32 to vector<16x128xi32>
      %31 = arith.cmpi slt, %16, %30 : vector<16x128xi32>
      %32 = arith.andi %29, %31 : vector<16x128xi1>
      %cst_17 = arith.constant -1.000000e+30 : f32
      %33 = vector.broadcast %cst_17 : f32 to vector<16x128xf32>
      %34 = arith.select %32, %15, %33 : vector<16x128xi1>, vector<16x128xf32>
      %cst_18 = arith.constant dense<0xFF800000> : vector<16xf32>
      %35 = vector.multi_reduction <maximumf>, %34, %cst_18 [1] : vector<16x128xf32> to vector<16xf32>
      %36 = vector.shape_cast %35 : vector<16xf32> to vector<16x1xf32>
      %37 = vector.broadcast %36 : vector<16x1xf32> to vector<16x128xf32>
      %38 = arith.subf %34, %37 : vector<16x128xf32>
      %39 = math.exp %38 : vector<16x128xf32>
      %cst_19 = arith.constant 0.000000e+00 : f32
      %40 = vector.broadcast %cst_19 : f32 to vector<16x128xf32>
      %41 = arith.select %32, %39, %40 : vector<16x128xi1>, vector<16x128xf32>
      %cst_20 = arith.constant dense<0.000000e+00> : vector<16xf32>
      %42 = vector.multi_reduction <add>, %41, %cst_20 [1] : vector<16x128xf32> to vector<16xf32>
      %43 = vector.shape_cast %42 : vector<16xf32> to vector<16x1xf32>
      %44 = tpu.reciprocal %43 {approx = true} : vector<16x1xf32> -> vector<16x1xf32>
      %45 = vector.broadcast %44 : vector<16x1xf32> to vector<16x128xf32>
      %46 = arith.mulf %41, %45 : vector<16x128xf32>
      %47 = arith.select %32, %46, %27 : vector<16x128xi1>, vector<16x128xf32>
      %c0_21 = arith.constant 0 : index
      %c0_22 = arith.constant 0 : index
      %48 = vector.load %arg5[%c0_21, %c0_22] : memref<16x128xf32, #tpu.memory_space<vmem>>, vector<16x128xf32>
      tpu.vector_store %arg5[%c0_21, %c0_22], %47 {strides = array<i32>} : memref<16x128xf32, #tpu.memory_space<vmem>>, vector<16x128xf32>,
    } else {
    }
    return
  }
  func.func @transform_0(%arg0: i32, %arg1: i32) -> (i32, i32) {
    %c0_i32 = arith.constant 0 : i32
    return %arg0, %arg1 : i32, i32
  }
  func.func @transform_1(%arg0: i32, %arg1: i32) -> (i32, i32) {
    %c0_i32 = arith.constant 0 : i32
    %c0_i32_0 = arith.constant 0 : i32
    return %arg1, %c0_i32 : i32, i32
  }
  func.func @transform_2(%arg0: i32, %arg1: i32) -> (i32, i32) {
    %c0_i32 = arith.constant 0 : i32
    %c0_i32_0 = arith.constant 0 : i32
    %c0_i32_1 = arith.constant 0 : i32
    return %c0_i32, %c0_i32_0 : i32, i32
  }
  func.func @transform_3(%arg0: i32, %arg1: i32) -> (i32, i32) {
    %c0_i32 = arith.constant 0 : i32
    %c0_i32_0 = arith.constant 0 : i32
    return %arg0, %c0_i32 : i32, i32
  }
}

</mosaic_0001>

<bundles_post_ra>
// kernel: tpu_custom_call.1
= control target key start
LH: loop header
LB: loop body
LE: loop exit
PB: predicated region body
PF: predicated region fallthrough
CT: control target
= control target key end

     0   :  { %8 = vsyncpa [#allocation4], 0  ;;  %s373_s0 = inlined_call_operand.hbm [shape: bf16[16,32], index: 0, kind: input, shape index: {}]   ;;  %s374_s1 = inlined_call_operand.hbm [shape: bf16[32,128], index: 1, kind: input, shape index: {}]   ;;  %s375_s2 = inlined_call_operand.vmem [shape: f32[1,128], index: 2, kind: input, shape index: {}]   ;;  %s376_s3 = inlined_call_operand.hbm [shape: f32[16,128], index: 3, kind: output, shape index: {}]  }
   0x1   :  { %9 = vsyncpa [#allocation7], 0 }
   0x2   :  { %10 = vsyncpa [#allocation5], 0  ;;  %s316_s12 = smov [#allocation3]  }
   0x3   :  { %s16_s13 = sshll.u32 %s316_s12, 4  ;;  %s17_s13 = int_to_ptr.vmem [resolvable:$true] %s16_s13 }
   0x4   :  { %s258_s14 = scalar_lea.vmem %s17_s13, 128  ;;  %p263_p1 = scmp.lt.s32.totalorder %s17_s13, %s17_s13 }
   0x5   :  { %p259_p0 = scmp.ne.s32.totalorder %s17_s13, %s258_s14  ;;  %p264_p2 = scmp.lt.s32.totalorder %s258_s14, %s258_s14 }
   0x7   :  { %p265_p3 = por %p264_p2, %p263_p1 }
   0x9   :  { %p266_p4 = pnand %p265_p3, %p259_p0 }
   0xb   :  { %269 = shalt.err (!%p266_p4)
}
   0xc   :  { %s317_s15 = smov 64   ;;  %s318_s16 = smov 4  }
   0xd   :  { %22 = dma.hbm_to_vmem [thread:$0]  %s373_s0, 128, %s17_s13, [#allocation4], %s317_s15, %s317_s15, %s318_s16  }
   0xe   :  { %s319_s19 = smov [#allocation6]  }
   0xf   :  { %s28_s20 = sshll.u32 %s319_s19, 4  ;;  %s29_s20 = int_to_ptr.vmem [resolvable:$true] %s28_s20 }
  0x10   :  { %s278_s21 = scalar_lea.vmem %s29_s20, 256  ;;  %p283_p6 = scmp.lt.s32.totalorder %s29_s20, %s29_s20 }
  0x11   :  { %p279_p5 = scmp.ne.s32.totalorder %s29_s20, %s278_s21  ;;  %p284_p7 = scmp.lt.s32.totalorder %s278_s21, %s278_s21 }
  0x13   :  { %p285_p8 = por %p284_p7, %p283_p6 }
  0x15   :  { %p286_p9 = pnand %p285_p8, %p279_p5 }
  0x17   :  { %289 = shalt.err (!%p286_p9)
}
  0x18   :  { %34 = dma.hbm_to_vmem [thread:$0]  %s374_s1, 256, %s29_s20, [#allocation7], %s317_s15, %s317_s15, %s318_s16  }
  0x19   :  { %310 = dma.done.wait [#allocation4], 128  }
  0x1a   :  { %311 = vsyncadd [#allocation4], 4294967168 }
  0x1b   :  { %312 = dma.done.wait [#allocation7], 256  }
  0x1c   :  { %313 = vsyncadd [#allocation7], 4294967040  ;;  %v320_v0 = vmov 0.0   ;;  %vm321_vm0 = vmmov 0   ;;  %v231_v1 = vld [vmem:[#allocation6 + $0x8] sm:$0xff]   ;;  %v232_v2 = vld [vmem:[#allocation6] sm:$0xff]   ;;  %v138_v4 = vlaneseq }
  0x1d   :  { %214 = vmatprep.subr.bf16.mxu0 %v320_v0  ;;  %218 = vmatprep.mubr.msk.bf16.mxu0 %vm321_vm0, %v320_v0  ;;  %v233_v3 = vld [vmem:[#allocation3] sm:$0xff]   ;;  %vm75_vm1 = vcmask 261120  }
  0x1e   :  { %215 = vmatpush3.bf16.msra.mxu0 %v231_v1  ;;  %v139_v5 = vand.u32 127, %v138_v4  ;;  %v208_v6 = vld [vmem:[%s375_s2] ss:$0 sm:$0xff]  ;;  %s322_s2 = smov [#allocation8]  }
  0x1f   :  { %216 = vmatprep.subr.bf16.mxu0 %v320_v0  ;;  %s191_s24 = sshll.u32 %s322_s2, 4  ;;  %s192_s24 = int_to_ptr.vmem [resolvable:$true] %s191_s24 }
  0x20   :  { %vm157_vm2 = vcmp.ge.s32.totalorder %v139_v5, 4  ;;  %vm158_vm3 = vcmp.lt.s32.totalorder %v139_v5, 20  ;;  %vm141_vm5 = vcmp.lt.s32.totalorder %v139_v5, 4  ;;  %s290_s25 = scalar_lea.vmem %s192_s24, 256  ;;  %p295_p11 = scmp.lt.s32.totalorder %s192_s24, %s192_s24 }
  0x21   :  { %vm354_vm4 = vmand %vm157_vm2, %vm158_vm3  ;;  %p291_p10 = scmp.ne.s32.totalorder %s192_s24, %s290_s25  ;;  %p296_p12 = scmp.lt.s32.totalorder %s290_s25, %s290_s25 }
  0x22   :  { %217 = vmatpush3.bf16.msra.mxu0 %v232_v2 }
  0x23   :  { %p297_p13 = por %p296_p12, %p295_p11 }
  0x25   :  { %219 = vmatmul.mubr.msk.bf16.vlgmr.msra.gmra.mxu0 %vm75_vm1, %v233_v3  ;;  %p298_p0 = pnand %p297_p13, %p291_p10 }
  0xe5   :  { %v113_v7 = vpop.f32.mrf.mxu0 }
  0xe6   :  { %v136_v9 = vadd.f32 %v208_v6, %v113_v7 }
  0xe7   :  { %v220_v10 = vpop.f32.mrf.mxu0 }
  0xe8   :  { %v209_v11 = vmul.f32 -1.442695, %v136_v9  ;;  %v160_v12 = vsel %vm354_vm4, %v136_v9, -1e+30 }
  0xe9   :  { %162 = vmax.xlane.f32.xlu0 %v160_v12  ;;  %v116_v13 = vpop.f32.mrf.mxu0 }
  0xea   :  { %234 = vpow2.f32 %v209_v11  ;;  %v137_v14 = vadd.f32 %v208_v6, %v116_v13 }
  0xeb   :  { %v221_v15 = vpop.f32.mrf.mxu0 }
  0xec   :  { %v210_v16 = vmul.f32 -1.442695, %v137_v14  ;;  %v161_v17 = vsel %vm354_vm4, %v137_v14, -1e+30 }
  0xed   :  { %164 = vmax.xlane.f32.xlu0 %v161_v17 }
  0xee   :  { %236 = vpow2.f32 %v210_v16 }
  0xf7   :  { %v235_v18 = vpop.eup %234 }
  0xf8   :  { %v149_v19 = vadd.f32 1.0, %v235_v18 }
  0xfa   :  { %238 = vrcp.f32 %v149_v19 }
  0xfb   :  { %v237_v20 = vpop.eup %236 }
  0xfc   :  { %v150_v21 = vadd.f32 1.0, %v237_v20 }
  0xfe   :  { %240 = vrcp.f32 %v150_v21 }
 0x107   :  { %v239_v22 = vpop.eup %238 }
 0x108   :  { %v155_v23 = vsel %vm141_vm5, %v239_v22, %v136_v9 }
 0x10b   :  { %v241_v24 = vpop.eup %240 }
 0x10c   :  { %v156_v25 = vsel %vm141_vm5, %v241_v24, %v137_v14 }
 0x172   :  { %v163_v26 = vpop.xlane.xlu0 %162 }
 0x173   :  { %v166_v27 = vsub.f32 %v160_v12, %v163_v26 }
 0x175   :  { %v168_v28 = vmul.f32 1.442695, %v166_v27 }
 0x176   :  { %v165_v29 = vpop.xlane.xlu0 %164 }
 0x177   :  { %242 = vpow2.f32 %v168_v28  ;;  %v167_v30 = vsub.f32 %v161_v17, %v165_v29 }
 0x179   :  { %v170_v31 = vmul.f32 1.442695, %v167_v30 }
 0x17b   :  { %244 = vpow2.f32 %v170_v31 }
 0x184   :  { %v243_v32 = vpop.eup %242 }
 0x185   :  { %v172_v33 = vsel %vm354_vm4, %v243_v32, 0.0 }
 0x186   :  { %174 = vadd.xlane.f32.xlu1 %v172_v33 }
 0x188   :  { %v245_v34 = vpop.eup %244 }
 0x189   :  { %v173_v35 = vsel %vm354_vm4, %v245_v34, 0.0 }
 0x18a   :  { %176 = vadd.xlane.f32.xlu1 %v173_v35 }
 0x20f   :  { %v175_v36 = vpop.xlane.xlu1 %174 }
 0x210   :  { %246 = vrcp.f32 %v175_v36 }
 0x213   :  { %v177_v37 = vpop.xlane.xlu1 %176 }
 0x214   :  { %248 = vrcp.f32 %v177_v37 }
 0x21d   :  { %v247_v38 = vpop.eup %246 }
 0x21e   :  { %v180_v39 = vmul.f32 %v247_v38, %v172_v33 }
 0x220   :  { %v182_v40 = vsel %vm354_vm4, %v180_v39, %v155_v23 }
 0x221   :  { %v249_v41 = vpop.eup %248  ;;  %184 = vst [vmem:[#allocation8] sm:$0xff] %v182_v40 }
 0x222   :  { %v181_v42 = vmul.f32 %v249_v41, %v173_v35 }
 0x224   :  { %v183_v43 = vsel %vm354_vm4, %v181_v42, %v156_v25 }
 0x225   :  { %185 = vst [vmem:[#allocation8 + $0x8] sm:$0xff] %v183_v43 }
 0x226   :  { %301 = shalt.err (!%p298_p0)
}
 0x227   :  { %s323_s26 = smov 128   ;;  %s324_s27 = smov 8  }
 0x228   :  { %197 = dma.vmem_to_hbm [thread:$0]  %s192_s24, 256, %s376_s3, [#allocation5], %s323_s26, %s323_s26, %s324_s27  }
 0x229   :  { %314 = dma.done.wait [#allocation5], 256  }
 0x22a   :  { %315 = vsyncadd [#allocation5], 4294967040 }
 0x22b   :  { %201 = vsyncpa [#allocation4], 1 }
 0x22c   :  { %202 = vsyncpa [#allocation7], 1 }
 0x22d   :  { %203 = vsyncpa [#allocation5], 1 }

</bundles_post_ra>
